<compile_context>
chip_gen: v6e
topology: v6e:2x2x1
jax: 0.10.0
libtpu: 0.0.40
codegen_flags: <defaults>
</compile_context>

<pallas_src>
import functools

import jax
import jax.numpy as jnp
from jax.experimental import pallas as pl
from jax.experimental.pallas import tpu as pltpu


def _layernorm_channel_kernel(x_ref, w_ref, b_ref, o_ref, *, eps, inv_c):
    # x_ref: (1, C, T); w_ref/b_ref: (C, 1) f32; o_ref: (1, C, T)
    x = x_ref[0].astype(jnp.float32)                          # (C, T)

    # Two-pass channel statistics (matches the PyTorch forward numerically).
    mean = jnp.sum(x, axis=0, keepdims=True) * inv_c          # (1, T)
    xc = x - mean                                             # (C, T)
    var = jnp.sum(xc * xc, axis=0, keepdims=True) * inv_c     # (1, T), biased
    inv = jax.lax.rsqrt(var + eps)                            # (1, T)

    # y = (x - mean) * inv * w + b, with (w * inv) folded into one broadcasted scale.
    scale = w_ref[...] * inv                                  # (C, 1) * (1, T) -> (C, T)
    o_ref[0] = (xc * scale + b_ref[...]).astype(o_ref.dtype)


def _pick_tile_hw(C, HW, lane_cap=2048, budget_bytes=12 << 20):
    """Largest lane tile (multiple of 128) that fits the VMEM budget and divides the
    128-rounded HW (avoids padding beyond the unavoidable 128-rounding)."""
    hw128 = pl.cdiv(HW, 128) * 128
    # 2x double-buffered input + 2x double-buffered output f32 slabs of (C, T):
    #   4 * C * T * 4 bytes <= budget
    max_t = budget_bytes // (16 * max(C, 1))
    max_t = max(128, (max_t // 128) * 128)
    cap = min(lane_cap, max_t, hw128)
    cap = max(128, (cap // 128) * 128)
    n = hw128 // 128
    k_cap = cap // 128
    best = 1
    for k in range(k_cap, 0, -1):
        if n % k == 0:
            best = k
            break
    return 128 * best


def layernorm_channel(x, weight, bias, eps=1e-5):
    """x: (B, C, H, W); weight, bias: (C,). LayerNorm over the channel axis (dim 1)."""
    B, C, H, W = x.shape
    HW = H * W

    t_hw = _pick_tile_hw(C, HW)
    hw_pad = pl.cdiv(HW, t_hw) * t_hw

    x2 = x.reshape(B, C, HW)
    if hw_pad != HW:
        # Pad the lane axis so every tile is full and stores stay lane-dense; sliced off below.
        x2 = jnp.pad(x2, ((0, 0), (0, 0), (0, hw_pad - HW)))

    w2 = weight.astype(jnp.float32).reshape(C, 1)
    b2 = bias.astype(jnp.float32).reshape(C, 1)

    kernel = functools.partial(
        _layernorm_channel_kernel, eps=float(eps), inv_c=float(1.0 / C)
    )

    n_hw_tiles = hw_pad // t_hw

    out = pl.pallas_call(
        kernel,
        out_shape=jax.ShapeDtypeStruct((B, C, hw_pad), x.dtype),
        grid_spec=pltpu.PrefetchScalarGridSpec(
            num_scalar_prefetch=0,
            grid=(B, n_hw_tiles),
            in_specs=[
                pl.BlockSpec((1, C, t_hw), lambda b, j: (b, 0, j)),
                pl.BlockSpec((C, 1), lambda b, j: (0, 0)),
                pl.BlockSpec((C, 1), lambda b, j: (0, 0)),
            ],
            out_specs=pl.BlockSpec((1, C, t_hw), lambda b, j: (b, 0, j)),
        ),
        compiler_params=pltpu.CompilerParams(
            dimension_semantics=("parallel", "parallel"),
            vmem_limit_bytes=32 << 20,
        ),
    )(x2, w2, b2)

    if hw_pad != HW:
        out = out[:, :, :HW]
    return out.reshape(B, C, H, W)


def layernorm_channel_ref(x, weight, bias, eps=1e-5):
    # Pure-JAX reference mirroring the PyTorch forward exactly.
    u = jnp.mean(x, axis=1, keepdims=True)
    s = jnp.mean((x - u) ** 2, axis=1, keepdims=True)
    xn = (x - u) / jnp.sqrt(s + eps)
    return weight[None, :, None, None] * xn + bias[None, :, None, None]


if __name__ == "__main__":
    key = jax.random.PRNGKey(0)
    B, C, H, W = 2, 4, 16, 16
    kx, kw, kb = jax.random.split(key, 3)

    x = jax.random.normal(kx, (B, C, H, W), dtype=jnp.float32)
    # Module init is ones/zeros; perturb deterministically so the affine part is exercised.
    weight = jnp.ones((C,), jnp.float32) + 0.1 * jax.random.normal(kw, (C,), jnp.float32)
    bias = jnp.zeros((C,), jnp.float32) + 0.1 * jax.random.normal(kb, (C,), jnp.float32)

    out = layernorm_channel(x, weight, bias)
    out = jax.block_until_ready(out)

    ref = layernorm_channel_ref(x, weight, bias)
    assert out.shape == (B, C, H, W)
    assert jnp.allclose(out, ref, atol=1e-5, rtol=1e-5), "mismatch vs reference"
    print("KERNEL_OK")
</pallas_src>

<mosaic_0001>
module attributes {stable_mosaic.version = 11 : i64} {
  func.func @_layernorm_channel_kernel(%arg0: i32, %arg1: i32, %arg2: memref<1x4x256xf32, #tpu.memory_space<vmem>>, %arg3: memref<4x1xf32, #tpu.memory_space<vmem>>, %arg4: memref<4x1xf32, #tpu.memory_space<vmem>>, %arg5: memref<1x4x256xf32, #tpu.memory_space<vmem>>) attributes {dimension_semantics = [#tpu.dimension_semantics<parallel>, #tpu.dimension_semantics<parallel>], iteration_bounds = array<i64: 2, 1>, scalar_prefetch = 0 : i64, scratch_operands = 0 : i64, tpu.core_type = #tpu.core_type<tc>, window_params = [{transform_indices = @transform_0, window_bounds = array<i64: 1, 4, 256>}, {pipeline_mode = #tpu.pipeline_mode<synchronous>, transform_indices = @transform_1, window_bounds = array<i64: 4, 1>}, {pipeline_mode = #tpu.pipeline_mode<synchronous>, transform_indices = @transform_2, window_bounds = array<i64: 4, 1>}, {transform_indices = @transform_3, window_bounds = array<i64: 1, 4, 256>}]} {
    %c0 = arith.constant 0 : index
    %c0_0 = arith.constant 0 : index
    %c0_1 = arith.constant 0 : index
    %0 = vector.load %arg2[%c0, %c0_0, %c0_1] : memref<1x4x256xf32, #tpu.memory_space<vmem>>, vector<1x4x256xf32>
    %1 = vector.shape_cast %0 : vector<1x4x256xf32> to vector<4x256xf32>
    %cst = arith.constant dense<0.000000e+00> : vector<256xf32>
    %2 = vector.multi_reduction <add>, %1, %cst [0] : vector<4x256xf32> to vector<256xf32>
    %3 = vector.shape_cast %2 : vector<256xf32> to vector<1x256xf32>
    %cst_2 = arith.constant 2.500000e-01 : f32
    %4 = vector.broadcast %cst_2 : f32 to vector<1x256xf32>
    %5 = arith.mulf %3, %4 : vector<1x256xf32>
    %6 = vector.broadcast %5 : vector<1x256xf32> to vector<4x256xf32>
    %7 = arith.subf %1, %6 : vector<4x256xf32>
    %8 = arith.mulf %7, %7 : vector<4x256xf32>
    %cst_3 = arith.constant dense<0.000000e+00> : vector<256xf32>
    %9 = vector.multi_reduction <add>, %8, %cst_3 [0] : vector<4x256xf32> to vector<256xf32>
    %10 = vector.shape_cast %9 : vector<256xf32> to vector<1x256xf32>
    %cst_4 = arith.constant 2.500000e-01 : f32
    %11 = vector.broadcast %cst_4 : f32 to vector<1x256xf32>
    %12 = arith.mulf %10, %11 : vector<1x256xf32>
    %cst_5 = arith.constant 9.99999974E-6 : f32
    %13 = vector.broadcast %cst_5 : f32 to vector<1x256xf32>
    %14 = arith.addf %12, %13 : vector<1x256xf32>
    %15 = math.rsqrt %14 : vector<1x256xf32>
    %c0_6 = arith.constant 0 : index
    %c0_7 = arith.constant 0 : index
    %16 = vector.load %arg3[%c0_6, %c0_7] : memref<4x1xf32, #tpu.memory_space<vmem>>, vector<4x1xf32>
    %17 = vector.broadcast %16 : vector<4x1xf32> to vector<4x256xf32>
    %18 = vector.broadcast %15 : vector<1x256xf32> to vector<4x256xf32>
    %19 = arith.mulf %17, %18 : vector<4x256xf32>
    %20 = arith.mulf %7, %19 : vector<4x256xf32>
    %c0_8 = arith.constant 0 : index
    %c0_9 = arith.constant 0 : index
    %21 = vector.load %arg4[%c0_8, %c0_9] : memref<4x1xf32, #tpu.memory_space<vmem>>, vector<4x1xf32>
    %22 = vector.broadcast %21 : vector<4x1xf32> to vector<4x256xf32>
    %23 = arith.addf %20, %22 : vector<4x256xf32>
    %c0_10 = arith.constant 0 : index
    %c0_11 = arith.constant 0 : index
    %c0_12 = arith.constant 0 : index
    %24 = vector.load %arg5[%c0_10, %c0_11, %c0_12] : memref<1x4x256xf32, #tpu.memory_space<vmem>>, vector<1x4x256xf32>
    %25 = vector.shape_cast %24 : vector<1x4x256xf32> to vector<4x256xf32>
    %26 = vector.shape_cast %23 : vector<4x256xf32> to vector<1x4x256xf32>
    tpu.vector_store %arg5[%c0_10, %c0_11, %c0_12], %26 {strides = array<i32>} : memref<1x4x256xf32, #tpu.memory_space<vmem>>, vector<1x4x256xf32>,
    return
  }
  func.func @transform_0(%arg0: i32, %arg1: i32) -> (i32, i32, i32) {
    %c0_i32 = arith.constant 0 : i32
    %c0_i32_0 = arith.constant 0 : i32
    return %arg0, %c0_i32, %arg1 : i32, i32, i32
  }
  func.func @transform_1(%arg0: i32, %arg1: i32) -> (i32, i32) {
    %c0_i32 = arith.constant 0 : i32
    %c0_i32_0 = arith.constant 0 : i32
    %c0_i32_1 = arith.constant 0 : i32
    return %c0_i32, %c0_i32_0 : i32, i32
  }
  func.func @transform_2(%arg0: i32, %arg1: i32) -> (i32, i32) {
    %c0_i32 = arith.constant 0 : i32
    %c0_i32_0 = arith.constant 0 : i32
    %c0_i32_1 = arith.constant 0 : i32
    return %c0_i32, %c0_i32_0 : i32, i32
  }
  func.func @transform_3(%arg0: i32, %arg1: i32) -> (i32, i32, i32) {
    %c0_i32 = arith.constant 0 : i32
    %c0_i32_0 = arith.constant 0 : i32
    return %arg0, %c0_i32, %arg1 : i32, i32, i32
  }
}

</mosaic_0001>

<bundles_post_ra>
// kernel: tpu_custom_call.1
= control target key start
LH: loop header
LB: loop body
LE: loop exit
PB: predicated region body
PF: predicated region fallthrough
CT: control target
= control target key end

     0   :  { %8 = vsyncpa [#allocation3], 0  ;;  %s755_s0 = inlined_call_operand.hbm [shape: f32[2,4,256], index: 0, kind: input, shape index: {}]   ;;  %s756_s1 = inlined_call_operand.vmem [shape: f32[4,1], index: 1, kind: input, shape index: {}]   ;;  %s757_s2 = inlined_call_operand.vmem [shape: f32[4,1], index: 2, kind: input, shape index: {}]   ;;  %s758_s3 = inlined_call_operand.hbm [shape: f32[2,4,256], index: 3, kind: output, shape index: {}]  }
   0x1   :  { %10 = vsyncpa [#allocation3 + $0x1], 0 }
   0x2   :  { %11 = vsyncpa [#allocation4], 0 }
   0x3   :  { %13 = vsyncpa [#allocation4 + $0x1], 0  ;;  %s607_s12 = smov 0   ;;  %s609_s13 = smov 0  }
   0x4   :  { %s611_s14 = smov 0   ;;  %s613_s15 = smov 0  }
   0x5   :  { %s615_s16 = smov 0   ;;  %s617_s17 = smov 0  }
   0x6 LB: > { %s386_s18 = sadd.s32 4294967295, %s581_s17   ;;  %s387_s19 = sadd.s32 4294967294, %s581_s17   ;;  %s581_s17 = sphi %s617_s17, %s19_s17   ;;  %s577_s16 = sphi %s615_s16, %s770_s16   ;;  %s573_s15 = sphi %s613_s15, %s769_s15   ;;  %s569_s14 = sphi %s611_s14, %s768_s14   ;;  %s565_s13 = sphi %s609_s13, %s767_s13   ;;  %s561_s12 = sphi %s607_s12, %s766_s12  }
   0x7   : > { %s31_s20 = sadd.s32 1, %s577_s16  ;;  %s40_s21 = sadd.s32 1, %s569_s14 }
   0x8   : > { %p33_p0 = scmp.ge.s32.totalorder %s31_s20, 2  ;;  %p47_p1 = scmp.ne.s32.totalorder %s569_s14, %s565_s13 }
   0x9   : > { %p48_p2 = scmp.eq.s32.totalorder %s581_s17, 0  ;;  %p53_p3 = scmp.ne.s32.totalorder %s565_s13, %s561_s12 }
   0xa   : > { %s772_s20 = smov (%p33_p0, %s31_s20), 0  ;;  %p54_p5 = scmp.eq.s32.totalorder %s386_s18, 0 }
   0xb   : > { %p648_p4 = por %p48_p2, %p47_p1  ;;  %s35_s23 = ssub.s32 %s577_s16, %s772_s20 }
   0xc   : > { %p121_p6 = scmp.eq.s32.totalorder %s386_s18, 1  ;;  %p38_p7 = scmp.eq.s32.totalorder %s35_s23, 0 }
   0xd   : > { %p654_p8 = por %p54_p5, %p53_p3  ;;  %p127_p10 = scmp.eq.s32.totalorder %s387_s19, 1 }
   0xe   : > { %p658_p9 = por %p121_p6, %p47_p1  ;;  %p415_p13 = scmp.lt.s32.totalorder %s581_s17, 2 }
   0xf   : > { %s663_s26 = scalar_select %p38_p7, %s569_s14, %s40_s21  }
  0x10   : > { %p665_p11 = por %p127_p10, %p53_p3  ;;  %s153_s28 = sand.u32 1, %s569_s14  }
  0x11   : > { %s390_s29 = sshll.u32 %s153_s28, 3  ;;  %s401_s30 = sshll.u32 %s577_s16, 7 }
  0x12   : > { %s762_s27 = scalar_select %p665_p11, 1, 0 }
  0x13   : > { %s165_s6 = scalar_lea.hbm %s755_s0, %s401_s30  ;;  %s157_s7 = scalar_lea.vmem [#allocation2], %s390_s29 }
  0x14   : > { %s167_s8 = sshll.u32 %s157_s7, 4  ;;  %p678_p0 = pnand %p415_p13, %p648_p4  ;;  %s168_s8 = int_to_ptr.vmem [resolvable:$true] %s167_s8 }
  0x15   : > { %p393_p1 = scmp.ge.s32.totalorder %s581_s17, 1  ;;  %p172_p2 = scmp.lt.s32.totalorder %s581_s17, 3 }
  0x16   : > { %s154_s10 = scalar_lea.sflag [#allocation3], %s153_s28  ;;  %p475_p3 = pneg %p678_p0 }
  0x17   : > { %s486_s11 = scalar_lea.vmem %s168_s8, 128  ;;  %s583_s18 = smov [#allocation2]  }
  0x18   : > { %p487_p5 = scmp.ne.s32.totalorder %s168_s8, %s486_s11  ;;  %s491_s19 = sshll.u32 %s583_s18, 4  ;;  %s492_s19 = int_to_ptr.vmem [resolvable:$false] %s491_s19 }
  0x19   : > { %s493_s21 = scalar_lea.vmem %s492_s19, 256  ;;  %p494_p10 = scmp.lt.s32.totalorder %s168_s8, %s492_s19 }
  0x1a   : > { %p489_p6 = pnand %p487_p5, %p475_p3  ;;  %p495_p12 = scmp.lt.s32.totalorder %s493_s21, %s486_s11 }
  0x1c   : > { %p490_p7 = pneg %p489_p6  ;;  %p496_p4 = por %p495_p12, %p494_p10 }
  0x1e   : > { %p497_p13 = pnand %p496_p4, %p490_p7 }
  0x20   : > { %500 = shalt.err (!%p497_p13)
}
  0x21   : > { %410 = dma.hbm_to_vmem [thread:$0]  (!%p678_p0), %s165_s6, 128, %s168_s8, %s154_s10  }
  0x22   : > { %p173_p11 = pnand %p393_p1, %p172_p2 }
  0x23   : > { %s693_s22 = sand.u32 (!%p173_p11), 1, %s565_s13  }
  0x24   : > { %176 = sbr.rel (%p173_p11) target bundleno = 189 (0xbd), region = 32  ;;  %s394_s23 = sshll.u32 (!%p173_p11), %s693_s22, 3 }
  0x25   : > { %s179_s28 = scalar_lea.sflag (!%p173_p11), [#allocation3], %s693_s22  ;;  %s182_s29 = scalar_lea.vmem (!%p173_p11), [#allocation2], %s394_s23 }
  0x29   : > { %552 = dma.done.wait (%p654_p8), %s179_s28, 128  }
  0x2a   : > { %554 = vsyncadd (%p654_p8), %s179_s28, 4294967168  ;;  %v584_v0 = vmov 0   ;;  %v257_v1 = vld [vmem:[%s756_s1] sm:$0xf]  ;;  %vm211_vm0 = vcmask 1043456   ;;  %v278_v45 = vlaneseq  ;;  %s402_s24 = sshll.u32 %s573_s15, 7 }
  0x2b   : > { %467 = vset.pattern.permute.xlu0 %v584_v0  ;;  %v270_v2 = vld [vmem:[%s757_s2] sm:$0xf]  ;;  %v585_v43 = vmov 839922192   ;;  %s204_s7 = scalar_lea.vmem [#allocation5], %s394_s23  ;;  %s300_s11 = scalar_lea.hbm %s758_s3, %s402_s24 }
  0x2c   : > { %260 = vperm.xlu0 %467, %v257_v1   ;;  %v207_v3 = vld [vmem:[%s182_s29] sm:$0xff]  ;;  %v276_v44 = vunpack.c.l.s4 %v585_v43  ;;  %v279_v48 = vshrl.u32 %v278_v45, 7  ;;  %s302_s8 = sshll.u32 %s204_s7, 4  ;;  %s286_s18 = scalar_lea.sflag [#allocation4], %s693_s22  ;;  %s303_s8 = int_to_ptr.vmem [resolvable:$true] %s302_s8 }
  0x2d   : > { %v209_v4 = vcombine.high %v207_v3, %v207_v3  ;;  %v212_v5 = vsel %vm211_vm0, %v207_v3, 0.0  ;;  %s501_s19 = scalar_lea.vmem %s303_s8, 128  ;;  %s586_s21 = smov [#allocation5]  }
  0x2e   : > { %v213_v7 = vrot.slane %v212_v5, 4  ;;  %v277_v47 = vunpack.c.0.s8 %v276_v44  ;;  %p502_p8 = scmp.ne.s32.totalorder %s303_s8, %s501_s19  ;;  %s505_s15 = sshll.u32 %s586_s21, 4  ;;  %s506_s15 = int_to_ptr.vmem [resolvable:$false] %s505_s15 }
  0x2f   : > { %v219_v6 = vsel %vm211_vm0, %v209_v4, 0.0  ;;  %s507_s23 = scalar_lea.vmem %s506_s15, 256  ;;  %p508_p0 = scmp.lt.s32.totalorder %s303_s8, %s506_s15 }
  0x30   : > { %273 = vperm.xlu0 %467, %v270_v2   ;;  %v220_v8 = vrot.slane %v219_v6, 4  ;;  %v214_v9 = vadd.f32 %v213_v7, %v212_v5  ;;  %v280_v53 = vsub.s32 %v277_v47, %v279_v48  ;;  %p503_p11 = pnand %p502_p8, %p658_p9  ;;  %p509_p1 = scmp.lt.s32.totalorder %s507_s23, %s501_s19 }
  0x32   : > { %v221_v10 = vadd.f32 %v220_v8, %v219_v6  ;;  %v215_v11 = vrot.slane %v214_v9, 2  ;;  %p504_p12 = pneg %p503_p11  ;;  %p510_p2 = por %p509_p1, %p508_p0 }
  0x34   : > { %v222_v12 = vrot.slane %v221_v10, 2  ;;  %v216_v13 = vadd.f32 %v215_v11, %v214_v9  ;;  %p511_p3 = pnand %p510_p2, %p504_p12 }
  0x36   : > { %v223_v14 = vadd.f32 %v222_v12, %v221_v10  ;;  %v217_v15 = vrot.slane %v216_v13, 1 }
  0x38   : > { %v224_v16 = vrot.slane %v223_v14, 1  ;;  %v218_v17 = vadd.f32 %v217_v15, %v216_v13 }
  0x3a   : > { %v225_v18 = vadd.f32 %v224_v16, %v223_v14  ;;  %v226_v19 = vmul.f32 0.25, %v218_v17 }
  0x3c   : > { %v227_v20 = vmul.f32 0.25, %v225_v18 }
  0x3e   : > { %v230_v21 = vcombine.low %v226_v19, %v227_v20 }
  0x40   : > { %v232_v22 = vsub.f32 %v207_v3, %v230_v21 }
  0x42   : > { %v233_v23 = vmul.f32 %v232_v22, %v232_v22 }
  0x44   : > { %v235_v24 = vcombine.high %v233_v23, %v233_v23  ;;  %v237_v25 = vsel %vm211_vm0, %v233_v23, 0.0 }
  0x45   : > { %v238_v27 = vrot.slane %v237_v25, 4 }
  0x46   : > { %v244_v26 = vsel %vm211_vm0, %v235_v24, 0.0 }
  0x47   : > { %v245_v28 = vrot.slane %v244_v26, 4  ;;  %v239_v29 = vadd.f32 %v238_v27, %v237_v25 }
  0x49   : > { %v246_v30 = vadd.f32 %v245_v28, %v244_v26  ;;  %v240_v31 = vrot.slane %v239_v29, 2 }
  0x4b   : > { %v247_v32 = vrot.slane %v246_v30, 2  ;;  %v241_v33 = vadd.f32 %v240_v31, %v239_v29 }
  0x4d   : > { %v248_v34 = vadd.f32 %v247_v32, %v246_v30  ;;  %v242_v35 = vrot.slane %v241_v33, 1 }
  0x4f   : > { %v249_v36 = vrot.slane %v248_v34, 1  ;;  %v243_v37 = vadd.f32 %v242_v35, %v241_v33 }
  0x51   : > { %v250_v38 = vadd.f32 %v249_v36, %v248_v34  ;;  %v251_v39 = vmul.f32 0.25, %v243_v37 }
  0x53   : > { %v252_v40 = vmul.f32 0.25, %v250_v38  ;;  %v253_v41 = vadd.f32 1e-05, %v251_v39 }
  0x55   : > { %v254_v42 = vadd.f32 1e-05, %v252_v40  ;;  %469 = vrsqrt.f32 %v253_v41 }
  0x57   : > { %471 = vrsqrt.f32 %v254_v42 }
  0x62   : > { %v470_v46 = vpop.eup %469 }
  0x64   : > { %v472_v49 = vpop.eup %471 }
  0xa7   : > { %v261_v50 = vpop.permute.xlu0 %260 }
  0xa8   : > { %v263_v51 = vmul.f32 %v470_v46, %v261_v50  ;;  %v264_v52 = vmul.f32 %v472_v49, %v261_v50 }
  0xaa   : > { %v267_v54 = vcombine.low %v263_v51, %v264_v52 }
  0xab   : > { %v274_v55 = vpop.permute.xlu0 %273 }
  0xac   : > { %v269_v56 = vmul.f32 %v267_v54, %v232_v22  ;;  %v281_v57 = vrot.slane %v274_v55, %v280_v53 }
  0xae   : > { %v283_v58 = vadd.f32 %v281_v57, %v269_v56 }
  0xb0   : > { %284 = vst [vmem:[%s204_s7] sm:$0xff] %v283_v58 }
  0xb1   : > { %514 = shalt.err (!%p511_p3)
}
  0xb2   : > { %s515_s28 = scalar_lea.hbm %s300_s11, 128  ;;  %s519_s30 = scalar_lea.hbm %s758_s3, 256 }
  0xb3   : > { %p516_p5 = scmp.ne.s32.totalorder %s300_s11, %s515_s28  ;;  %p520_p10 = scmp.lt.s32.totalorder %s300_s11, %s758_s3 }
  0xb4   : > { %p521_p4 = scmp.lt.s32.totalorder %s519_s30, %s515_s28 }
  0xb5   : > { %p517_p6 = pnand %p516_p5, %p658_p9 }
  0xb6   : > { %p522_p13 = por %p521_p4, %p520_p10 }
  0xb7   : > { %p518_p7 = pneg %p517_p6 }
  0xb9   : > { %p523_p8 = pnand %p522_p13, %p518_p7 }
  0xbb   : > { %526 = shalt.err (!%p523_p8)
}
  0xbc   : > { %405 = dma.vmem_to_hbm [thread:$0]  (%p658_p9), %s303_s8, 128, %s300_s11, %s286_s18  }
  0xbd PF: > { %s314_s6 = sand.u32 1, %s561_s12   ;;  %p764_p11 = scmp.ne.s32.totalorder %s762_s27, 0 }
  0xbe   : > { %p765_p12 = scmp.ge.s32.totalorder %s581_s17, 2  ;;  %s315_s24 = scalar_lea.sflag [#allocation4], %s314_s6 }
  0xc0   : > { %p412_p0 = pnand %p765_p12, %p764_p11 }
  0xc2   : > { %p413_p1 = pneg %p412_p0 }
  0xc4   : > { %556 = dma.done.wait (%p413_p1), %s315_s24, 128  }
  0xc5   : > { %558 = vsyncadd (%p413_p1), %s315_s24, 4294967168  ;;  %s19_s17 = sadd.s32 1, %s581_s17   ;;  %s766_s12 = smov %s565_s13 }
  0xc6   : > { %p16_p2 = scmp.ge.s32.totalorder %s19_s17, 4   ;;  %s767_s13 = smov %s569_s14 }
  0xc7   : > { %s768_s14 = smov %s663_s26  ;;  %s769_s15 = smov %s577_s16 }
  0xc8   : > { %s770_s16 = smov %s772_s20  ;;  %18 = sbr.rel (!%p16_p2) target bundleno = 6 (0x6), region = 77 }
  0xcd   :  { %320 = vsyncpa [#allocation3], 1 }
  0xce   :  { %322 = vsyncpa [#allocation3 + $0x1], 1 }
  0xcf   :  { %323 = vsyncpa [#allocation4], 1 }
  0xd0   :  { %325 = vsyncpa [#allocation4 + $0x1], 1 }

</bundles_post_ra>
